<compile_context>
chip_gen: v6e
topology: v6e:2x2x1
jax: 0.10.0
libtpu: 0.0.40
codegen_flags: <defaults>
</compile_context>

<pallas_src>
import functools

import jax
import jax.numpy as jnp
from jax.experimental import pallas as pl
from jax.experimental.pallas import tpu as pltpu


# ----------------------------- tiling policy --------------------------------

# Target pipelined VMEM footprint for the x/out double buffers.  24 MiB keeps
# us safely inside v7x's 64 MiB physical VMEM while per-block sizes stay in
# the multi-MiB regime that reaches ~85% of HBM roofline on v5e/v6e.
_PIPELINE_BUDGET_BYTES = 24 * 1024 * 1024


def _round_up(n, m):
    return (n + m - 1) // m * m


def _vmem_limit_bytes():
    # Raise the scoped VMEM limit (defaults: 16 MiB on v5e, 32 MiB on v6e/v7x)
    # so the large row tiles are legal, while leaving headroom below physical
    # capacity (64 MiB on v7x, 128 MiB on v5e/v6e).
    try:
        cap = int(pltpu.get_tpu_info().vmem_capacity_bytes)
    except Exception:
        cap = 128 * 1024 * 1024
    return min(64 * 1024 * 1024, (cap * 3) // 4)


def _choose_tile_rows(rows, hw_pad, in_itemsize, out_itemsize):
    """Largest row tile (multiple of 8) whose double-buffered x+out footprint
    fits the budget, while keeping >=2 grid steps when there is enough work so
    both v7x TensorCores get a share of the (parallel) row axis."""
    rows8 = _round_up(rows, 8)
    # grid-resident weight/bias block (lane-padded to 128 in VMEM, x2 buffers)
    wb_bytes = 2 * rows8 * 128 * 4
    budget = max(1 << 20, _PIPELINE_BUDGET_BYTES - wb_bytes)
    per_row = hw_pad * (in_itemsize + out_itemsize) * 2  # two buffers each
    tr = max(8, (budget // per_row) // 8 * 8)
    if rows8 > 8:
        tr = min(tr, _round_up(pl.cdiv(rows8, 2), 8))
    return min(tr, rows8)


# -------------------------------- kernel -------------------------------------


def _instance_norm_kernel(wb_ref, x_ref, o_ref, *, eps, hw, tile_rows):
    # wb_ref: (rows_p, 2) f32, grid-resident (col 0 = weight, col 1 = bias)
    # x_ref / o_ref: (tile_rows, hw_pad) blocks; hw_pad is lane-dense (%128==0)
    row0 = pl.multiple_of(pl.program_id(0) * tile_rows, 8)
    wb = wb_ref[pl.ds(row0, tile_rows), :]               # (tr, 2) — no per-step DMA
    w = wb[:, 0:1]
    b = wb[:, 1:2]

    x = x_ref[...].astype(jnp.float32)                   # (tr, hw_pad)
    hw_pad = x.shape[-1]
    inv_n = 1.0 / hw
    # padded lanes are zero-filled, so the plain sum is already the true sum
    mean = jnp.sum(x, axis=-1, keepdims=True) * inv_n
    d = x - mean
    if hw_pad != hw:                                      # static branch
        lane = jax.lax.broadcasted_iota(jnp.int32, x.shape, 1)
        d = jnp.where(lane < hw, d, 0.0)
    # two-pass biased variance E[(x-mean)^2]: no E[x^2]-mean^2 cancellation
    var = jnp.maximum(jnp.sum(d * d, axis=-1, keepdims=True) * inv_n, 0.0)
    inv_std = jax.lax.rsqrt(var + eps)

    # fold per-row scalars once so the elementwise pass is a single mul+add
    scale = inv_std * w
    shift = b - mean * scale
    o_ref[...] = (x * scale + shift).astype(o_ref.dtype)


@functools.lru_cache(maxsize=None)
def _build_instance_norm_call(rows_p, hw_pad, tr, dtype_name, hw, eps):
    dtype = jnp.dtype(dtype_name)
    return pl.pallas_call(
        functools.partial(_instance_norm_kernel, eps=eps, hw=hw, tile_rows=tr),
        out_shape=jax.ShapeDtypeStruct((rows_p, hw_pad), dtype),
        grid_spec=pltpu.PrefetchScalarGridSpec(
            num_scalar_prefetch=0,
            grid=(rows_p // tr,),
            in_specs=[
                # weight/bias: whole array resident across the grid
                pl.BlockSpec((rows_p, 2), lambda i: (0, 0)),
                # x row blocks (default double-buffering; pl.Buffered(3) is an
                # optional knob if xprof ever shows exposed DMA at huge H*W)
                pl.BlockSpec((tr, hw_pad), lambda i: (i, 0)),
            ],
            out_specs=pl.BlockSpec((tr, hw_pad), lambda i: (i, 0)),
        ),
        compiler_params=pltpu.CompilerParams(
            dimension_semantics=("parallel",),
            vmem_limit_bytes=_vmem_limit_bytes(),
        ),
    )


def adaptive_instance_norm_2d(x, weight, bias, *, eps=1e-5):
    """x: (B, C, H, W); weight, bias: (B*C,).  Returns (B, C, H, W)."""
    b, c, h, w = x.shape
    rows, hw = b * c, h * w

    # lane-dense output: pad H*W to a multiple of 128 (zero fill; reductions
    # use the true hw), avoiding masked vst partial stores for odd H*W.
    hw_pad = _round_up(hw, 128)

    # keep HBM traffic in the input dtype (bf16 stays bf16); upcast in-kernel
    x2 = x.reshape(rows, hw)
    if hw_pad != hw:
        x2 = jnp.pad(x2, ((0, 0), (0, hw_pad - hw)))

    tr = _choose_tile_rows(rows, hw_pad, x.dtype.itemsize, x.dtype.itemsize)
    rows_p = _round_up(rows, tr)
    if rows_p != rows:
        x2 = jnp.pad(x2, ((0, rows_p - rows), (0, 0)))

    # merge weight & bias into one small grid-resident array
    wb = jnp.stack(
        [weight.reshape(rows).astype(jnp.float32),
         bias.reshape(rows).astype(jnp.float32)], axis=-1)
    if rows_p != rows:
        wb = jnp.pad(wb, ((0, rows_p - rows), (0, 0)))

    call = _build_instance_norm_call(rows_p, hw_pad, tr, x.dtype.name, hw,
                                     float(eps))
    out2 = call(wb, x2)
    return out2[:rows, :hw].reshape(b, c, h, w)


# ----------------------- ResBlocks forward (norm='in') -----------------------


def instance_norm_2d(x, *, eps=1e-5):
    # nn.InstanceNorm2d default (affine=False): weight=1, bias=0
    bc = x.shape[0] * x.shape[1]
    return adaptive_instance_norm_2d(
        x, jnp.ones((bc,), jnp.float32), jnp.zeros((bc,), jnp.float32), eps=eps)


def _conv3x3(x, w, b):
    # ZeroPad2d(1) + Conv2d(dim, dim, 3, stride=1, bias=True)  (plain XLA)
    y = jax.lax.conv_general_dilated(
        x, w, window_strides=(1, 1), padding=((1, 1), (1, 1)),
        dimension_numbers=("NCHW", "OIHW", "NCHW"),
        precision=jax.lax.Precision.HIGHEST)
    return y + b.reshape(1, -1, 1, 1)


def res_block(x, p, *, eps=1e-5):
    # Conv2dBlock(norm='in', act='relu') -> Conv2dBlock(norm='in', act='none')
    y = _conv3x3(x, p["w1"], p["b1"])
    y = instance_norm_2d(y, eps=eps)
    y = jnp.maximum(y, 0.0)
    y = _conv3x3(y, p["w2"], p["b2"])
    y = instance_norm_2d(y, eps=eps)
    return x + y


def res_blocks(x, params, *, eps=1e-5):
    for p in params:
        x = res_block(x, p, eps=eps)
    return x


# ------------------------------ references ----------------------------------


def _adain_reference(x, weight, bias, eps=1e-5):
    b, c, h, w = x.shape
    xr = x.reshape(b * c, h * w).astype(jnp.float32)
    mean = xr.mean(-1, keepdims=True)
    var = ((xr - mean) ** 2).mean(-1, keepdims=True)
    y = (xr - mean) / jnp.sqrt(var + eps)
    y = y * weight.reshape(-1, 1) + bias.reshape(-1, 1)
    return y.reshape(b, c, h, w).astype(x.dtype)


def _instance_norm_reference(x, eps=1e-5):
    bc = x.shape[0] * x.shape[1]
    return _adain_reference(x, jnp.ones((bc,)), jnp.zeros((bc,)), eps)


def _res_blocks_reference(x, params, eps=1e-5):
    for p in params:
        y = _conv3x3(x, p["w1"], p["b1"])
        y = _instance_norm_reference(y, eps)
        y = jnp.maximum(y, 0.0)
        y = _conv3x3(y, p["w2"], p["b2"])
        y = _instance_norm_reference(y, eps)
        x = x + y
    return x


if __name__ == "__main__":
    key = jax.random.PRNGKey(0)

    # --- AdaIN kernel check (B*C=8 rows, H*W=256 lanes) ---
    B, C, H, W = 2, 4, 16, 16
    kx, kw, kb, key = jax.random.split(key, 4)
    x = jax.random.normal(kx, (B, C, H, W), dtype=jnp.float32)
    weight = jax.random.normal(kw, (B * C,), dtype=jnp.float32)
    bias = jax.random.normal(kb, (B * C,), dtype=jnp.float32)
    out = jax.block_until_ready(adaptive_instance_norm_2d(x, weight, bias))
    assert out.shape == (B, C, H, W)
    assert jnp.allclose(out, _adain_reference(x, weight, bias),
                        atol=1e-4, rtol=1e-4), "AdaIN mismatch vs reference"

    # --- odd spatial size: exercises lane padding, masked variance, row pad ---
    kx2, kw2, kb2, key = jax.random.split(key, 4)
    x_odd = 3.0 * jax.random.normal(kx2, (3, 5, 7, 7), dtype=jnp.float32) + 5.0
    w_odd = jax.random.normal(kw2, (15,), dtype=jnp.float32)
    b_odd = jax.random.normal(kb2, (15,), dtype=jnp.float32)
    out_odd = jax.block_until_ready(adaptive_instance_norm_2d(x_odd, w_odd, b_odd))
    assert jnp.allclose(out_odd, _adain_reference(x_odd, w_odd, b_odd),
                        atol=1e-4, rtol=1e-4), "padded AdaIN mismatch"

    # --- ResBlocks(num_blocks=2, dim=4, norm='in', act='relu', pad='zero') ---
    num_blocks, dim = 2, 4
    kx3, key = jax.random.split(key)
    xr = jax.random.normal(kx3, (2, dim, 16, 16), dtype=jnp.float32)
    params = []
    for _ in range(num_blocks):
        k1, k2, k3, k4, key = jax.random.split(key, 5)
        params.append(dict(
            w1=0.1 * jax.random.normal(k1, (dim, dim, 3, 3), jnp.float32),
            b1=0.1 * jax.random.normal(k2, (dim,), jnp.float32),
            w2=0.1 * jax.random.normal(k3, (dim, dim, 3, 3), jnp.float32),
            b2=0.1 * jax.random.normal(k4, (dim,), jnp.float32),
        ))
    out_rb = jax.block_until_ready(res_blocks(xr, params))
    assert out_rb.shape == xr.shape
    assert jnp.allclose(out_rb, _res_blocks_reference(xr, params),
                        atol=1e-3, rtol=1e-3), "ResBlocks mismatch vs reference"

    print("KERNEL_OK")
</pallas_src>

<mosaic_0001>
module attributes {stable_mosaic.version = 11 : i64} {
  func.func @_instance_norm_kernel(%arg0: i32, %arg1: memref<8x2xf32, #tpu.memory_space<vmem>>, %arg2: memref<8x256xf32, #tpu.memory_space<vmem>>, %arg3: memref<8x256xf32, #tpu.memory_space<vmem>>) attributes {dimension_semantics = [#tpu.dimension_semantics<parallel>], iteration_bounds = array<i64: 1>, scalar_prefetch = 0 : i64, scratch_operands = 0 : i64, tpu.core_type = #tpu.core_type<tc>, window_params = [{pipeline_mode = #tpu.pipeline_mode<synchronous>, transform_indices = @transform_0, window_bounds = array<i64: 8, 2>}, {transform_indices = @transform_1, window_bounds = array<i64: 8, 256>}, {transform_indices = @transform_2, window_bounds = array<i64: 8, 256>}]} {
    %c8_i32 = arith.constant 8 : i32
    %0 = arith.muli %arg0, %c8_i32 : i32
    %1 = tpu.assume_multiple %0, 8 : i32
    %2 = arith.index_cast %1 : i32 to index
    %c0 = arith.constant 0 : index
    %3 = vector.load %arg1[%2, %c0] : memref<8x2xf32, #tpu.memory_space<vmem>>, vector<8x2xf32>
    %4 = vector.extract_strided_slice %3 {offsets = [0, 0], sizes = [8, 1], strides = [1, 1]} : vector<8x2xf32> to vector<8x1xf32>
    %5 = vector.extract_strided_slice %3 {offsets = [0, 1], sizes = [8, 1], strides = [1, 1]} : vector<8x2xf32> to vector<8x1xf32>
    %c0_0 = arith.constant 0 : index
    %c0_1 = arith.constant 0 : index
    %6 = vector.load %arg2[%c0_0, %c0_1] : memref<8x256xf32, #tpu.memory_space<vmem>>, vector<8x256xf32>
    %cst = arith.constant dense<0.000000e+00> : vector<8xf32>
    %7 = vector.multi_reduction <add>, %6, %cst [1] : vector<8x256xf32> to vector<8xf32>
    %8 = vector.shape_cast %7 : vector<8xf32> to vector<8x1xf32>
    %cst_2 = arith.constant 3.906250e-03 : f32
    %9 = vector.broadcast %cst_2 : f32 to vector<8x1xf32>
    %10 = arith.mulf %8, %9 : vector<8x1xf32>
    %11 = vector.broadcast %10 : vector<8x1xf32> to vector<8x256xf32>
    %12 = arith.subf %6, %11 : vector<8x256xf32>
    %13 = arith.mulf %12, %12 : vector<8x256xf32>
    %cst_3 = arith.constant dense<0.000000e+00> : vector<8xf32>
    %14 = vector.multi_reduction <add>, %13, %cst_3 [1] : vector<8x256xf32> to vector<8xf32>
    %15 = vector.shape_cast %14 : vector<8xf32> to vector<8x1xf32>
    %cst_4 = arith.constant 3.906250e-03 : f32
    %16 = vector.broadcast %cst_4 : f32 to vector<8x1xf32>
    %17 = arith.mulf %15, %16 : vector<8x1xf32>
    %cst_5 = arith.constant 0.000000e+00 : f32
    %18 = vector.broadcast %cst_5 : f32 to vector<8x1xf32>
    %19 = arith.maximumf %17, %18 : vector<8x1xf32>
    %cst_6 = arith.constant 9.99999974E-6 : f32
    %20 = vector.broadcast %cst_6 : f32 to vector<8x1xf32>
    %21 = arith.addf %19, %20 : vector<8x1xf32>
    %22 = math.rsqrt %21 : vector<8x1xf32>
    %23 = arith.mulf %22, %4 : vector<8x1xf32>
    %24 = arith.mulf %10, %23 : vector<8x1xf32>
    %25 = arith.subf %5, %24 : vector<8x1xf32>
    %26 = vector.broadcast %23 : vector<8x1xf32> to vector<8x256xf32>
    %27 = arith.mulf %6, %26 : vector<8x256xf32>
    %28 = vector.broadcast %25 : vector<8x1xf32> to vector<8x256xf32>
    %29 = arith.addf %27, %28 : vector<8x256xf32>
    %c0_7 = arith.constant 0 : index
    %c0_8 = arith.constant 0 : index
    %30 = vector.load %arg3[%c0_7, %c0_8] : memref<8x256xf32, #tpu.memory_space<vmem>>, vector<8x256xf32>
    tpu.vector_store %arg3[%c0_7, %c0_8], %29 {strides = array<i32>} : memref<8x256xf32, #tpu.memory_space<vmem>>, vector<8x256xf32>,
    return
  }
  func.func @transform_0(%arg0: i32) -> (i32, i32) {
    %c0_i32 = arith.constant 0 : i32
    %c0_i32_0 = arith.constant 0 : i32
    %c0_i32_1 = arith.constant 0 : i32
    return %c0_i32, %c0_i32_0 : i32, i32
  }
  func.func @transform_1(%arg0: i32) -> (i32, i32) {
    %c0_i32 = arith.constant 0 : i32
    %c0_i32_0 = arith.constant 0 : i32
    return %arg0, %c0_i32 : i32, i32
  }
  func.func @transform_2(%arg0: i32) -> (i32, i32) {
    %c0_i32 = arith.constant 0 : i32
    %c0_i32_0 = arith.constant 0 : i32
    return %arg0, %c0_i32 : i32, i32
  }
}

</mosaic_0001>

<bundles_post_ra>
// kernel: tpu_custom_call.1
= control target key start
LH: loop header
LB: loop body
LE: loop exit
PB: predicated region body
PF: predicated region fallthrough
CT: control target
= control target key end

     0   :  { %7 = vsyncpa [#allocation3], 0  ;;  %s164_s0 = inlined_call_operand.vmem [shape: f32[8,2], index: 0, kind: input, shape index: {}]   ;;  %s165_s1 = inlined_call_operand.hbm [shape: f32[8,256], index: 1, kind: input, shape index: {}]   ;;  %s166_s2 = inlined_call_operand.hbm [shape: f32[8,256], index: 2, kind: output, shape index: {}]  }
   0x1   :  { %8 = vsyncpa [#allocation4], 0  ;;  %s135_s9 = smov [#allocation2]  }
   0x2   :  { %s17_s10 = sshll.u32 %s135_s9, 4  ;;  %s18_s10 = int_to_ptr.vmem [resolvable:$true] %s17_s10 }
   0x3   :  { %s99_s11 = scalar_lea.vmem %s18_s10, 256  ;;  %p104_p1 = scmp.lt.s32.totalorder %s18_s10, %s18_s10 }
   0x4   :  { %p100_p0 = scmp.ne.s32.totalorder %s18_s10, %s99_s11  ;;  %p105_p2 = scmp.lt.s32.totalorder %s99_s11, %s99_s11 }
   0x6   :  { %p106_p3 = por %p105_p2, %p104_p1 }
   0x8   :  { %p107_p4 = pnand %p106_p3, %p100_p0 }
   0xa   :  { %110 = shalt.err (!%p107_p4)
}
   0xb   :  { %20 = dma.hbm_to_vmem [thread:$0]  %s165_s1, 256, %s18_s10, [#allocation3]  }
   0xc   :  { %131 = dma.done.wait [#allocation3], 256  }
   0xd   :  { %132 = vsyncadd [#allocation3], 4294967040  ;;  %v27_v0 = vld [vmem:[#allocation2] sm:$0xff]  ;;  %v28_v1 = vld [vmem:[#allocation2 + $0x8] sm:$0xff]  ;;  %v136_v10 = vmov 0   ;;  %v137_v15 = vmov 1  }
   0xe   :  { %v29_v2 = vadd.f32 %v28_v1, %v27_v0  ;;  %87 = vset.pattern.permute.xlu1 %v136_v10  ;;  %88 = vset.pattern.permute.xlu0 %v137_v15  ;;  %v26_v16 = vld [vmem:[%s164_s0] sm:$0xff]  ;;  %s138_s15 = smov 1   ;;  %s139_s16 = smov [#allocation5]  }
   0xf   :  { %s73_s17 = sshll.u32 %s139_s16, 4  ;;  %s74_s17 = int_to_ptr.vmem [resolvable:$true] %s73_s17 }
  0x10   :  { %30 = vadd.xlane.f32.xlu0 %v29_v2  ;;  %s111_s0 = scalar_lea.vmem %s74_s17, 256  ;;  %p116_p6 = scmp.lt.s32.totalorder %s74_s17, %s74_s17 }
  0x11   :  { %p112_p5 = scmp.ne.s32.totalorder %s74_s17, %s111_s0  ;;  %p117_p7 = scmp.lt.s32.totalorder %s111_s0, %s111_s0 }
  0x13   :  { %p118_p8 = por %p117_p7, %p116_p6 }
  0x15   :  { %p119_p9 = pnand %p118_p8, %p112_p5 }
  0x99   :  { %v31_v3 = vpop.xlane.xlu0 %30 }
  0x9a   :  { %v32_v4 = vmul.f32 0.00390625, %v31_v3 }
  0x9c   :  { %v33_v5 = vsub.f32 %v27_v0, %v32_v4  ;;  %v34_v6 = vsub.f32 %v28_v1, %v32_v4 }
  0x9e   :  { %v35_v7 = vmul.f32 %v33_v5, %v33_v5  ;;  %v36_v8 = vmul.f32 %v34_v6, %v34_v6 }
  0xa0   :  { %v37_v9 = vadd.f32 %v36_v8, %v35_v7 }
  0xa2   :  { %38 = vadd.xlane.f32.xlu0 %v37_v9 }
 0x12b   :  { %v39_v11 = vpop.xlane.xlu0 %38 }
 0x12c   :  { %v40_v12 = vmul.f32 0.00390625, %v39_v11 }
 0x12e   :  { %v41_v13 = vmax.f32 %v40_v12, 0.0 }
 0x130   :  { %v42_v14 = vadd.f32 1e-05, %v41_v13 }
 0x132   :  { %89 = vrsqrt.f32 %v42_v14 }
 0x13f   :  { %v90_v17 = vpop.eup %89 }
 0x140   :  { %v44_v18 = vmul.f32 %v90_v17, %v26_v16 }
 0x142   :  { %v45_v19 = vmul.f32 %v44_v18, %v32_v4 }
 0x144   :  { %47 = vrot.lane.b32.xlu1 %v45_v19, %s138_s15 }
 0x148   :  { %53 = vperm.xlu1 %87, %v44_v18  }
 0x1b6   :  { %v48_v20 = vpop.permute.xlu1 %47 }
 0x1b7   :  { %v50_v21 = vsub.f32 %v26_v16, %v48_v20 }
 0x1b9   :  { %60 = vperm.xlu0 %88, %v50_v21  }
 0x1c3   :  { %v54_v22 = vpop.permute.xlu1 %53 }
 0x1c4   :  { %v56_v23 = vmul.f32 %v54_v22, %v27_v0  ;;  %v57_v24 = vmul.f32 %v54_v22, %v28_v1 }
 0x234   :  { %v61_v25 = vpop.permute.xlu0 %60 }
 0x235   :  { %v63_v26 = vadd.f32 %v61_v25, %v56_v23  ;;  %v64_v27 = vadd.f32 %v61_v25, %v57_v24 }
 0x237   :  { %65 = vst [vmem:[#allocation5] sm:$0xff] %v63_v26  ;;  %66 = vst [vmem:[#allocation5 + $0x8] sm:$0xff] %v64_v27 }
 0x238   :  { %122 = shalt.err (!%p119_p9)
}
 0x239   :  { %76 = dma.vmem_to_hbm [thread:$0]  %s74_s17, 256, %s166_s2, [#allocation4]  }
 0x23a   :  { %133 = dma.done.wait [#allocation4], 256  }
 0x23b   :  { %134 = vsyncadd [#allocation4], 4294967040 }
 0x23c   :  { %80 = vsyncpa [#allocation3], 1 }
 0x23d   :  { %81 = vsyncpa [#allocation4], 1 }

</bundles_post_ra>
